<compile_context>
chip_gen: v7x
topology: tpu7x:2x2x1
jax: 0.10.0
libtpu: 0.0.40
codegen_flags: <defaults>
</compile_context>

<pallas_src>
from typing import NamedTuple

import jax
import jax.numpy as jnp
from jax.experimental import pallas as pl
from jax.experimental.pallas import tpu as pltpu


_LANE = 128  # vreg lane width (last dim)


def _round_up(n, m):
    return ((n + m - 1) // m) * m


def _cdiv(a, b):
    return (a + b - 1) // b


def _packed_sublane(dtype):
    # Packed sublane tile: 8 rows for 4-byte dtypes, 16 for bf16, 32 for int8/fp8.
    return max(8, 32 // jnp.dtype(dtype).itemsize)


def _vmem_budget_bytes():
    # Generation-aware VMEM budget with headroom for Mosaic internal scratch:
    #   64 MiB/TC (v7x) -> 56 MiB,  128 MiB (v5e/v6e) -> 112 MiB.
    cap = 64 * 1024 * 1024
    try:
        info = pltpu.get_tpu_info()
        cap = int(getattr(info, "vmem_capacity_bytes", cap) or cap)
    except Exception:
        pass
    return cap - max(8 * 1024 * 1024, cap // 8)


class FFNParams(NamedTuple):
    w1: jax.Array        # (input_size, hid_p)  compute dtype
    b1: jax.Array        # (1, hid_p)           f32
    w2: jax.Array        # (hid_p, out_p)       compute dtype
    b2: jax.Array        # (1, out_p)           f32
    input_size: int
    hidden_size: int
    output_size: int


def prepare_params(w1_t, b1, w2_t, b2, *, compute_dtype=jnp.bfloat16):
    """One-time (init-time) padding + casting of the weights/biases.

    Hoisted out of the per-call path so forward calls do no wrapper-side weight
    traffic; inside the kernel the weights are DMA'd once and stay VMEM-resident.

    w1_t: (input_size, hidden)   pre-transposed (in, out)
    b1:   (hidden,) or (1, hidden)
    w2_t: (hidden, output_size)  pre-transposed (in, out)
    b2:   (output_size,) or (1, output_size)
    """
    in_size, hid = w1_t.shape
    out_size = w2_t.shape[1]
    b1 = jnp.asarray(b1).reshape(1, hid)
    b2 = jnp.asarray(b2).reshape(1, out_size)

    cdt = jnp.dtype(compute_dtype)
    # Pad only the *output* feature dims to the 128-lane width. Zero padding is
    # exact: padded hidden cols get zero weight cols + zero bias -> ReLU(0)=0 ->
    # they contribute nothing to the second matmul; padded output cols are sliced.
    hid_p = _round_up(hid, _LANE)
    out_p = _round_up(out_size, _LANE)

    def _prep(a, pad_rows, pad_cols, dt):
        if pad_rows or pad_cols:
            a = jnp.pad(a, ((0, pad_rows), (0, pad_cols)))
        return a.astype(dt)

    w1p = _prep(w1_t, 0, hid_p - hid, cdt)
    b1p = _prep(b1, 0, hid_p - hid, jnp.float32)
    w2p = _prep(w2_t, hid_p - hid, out_p - out_size, cdt)
    b2p = _prep(b2, 0, out_p - out_size, jnp.float32)
    return FFNParams(w1p, b1p, w2p, b2p, in_size, hid, out_size)


def _ffn_kernel(x_ref, w1_ref, b1_ref, w2_ref, b2_ref, o_ref):
    # Two MXU matmuls with fused bias + ReLU; operands already resident in VMEM.
    # x is cast to the compute dtype in-kernel (VPU) so the wrapper never copies it.
    x = x_ref[...].astype(w1_ref.dtype)
    h = jnp.dot(x, w1_ref[...], preferred_element_type=jnp.float32)
    h = jnp.maximum(h + b1_ref[...], 0.0)                       # bias + ReLU in f32
    y = jnp.dot(h.astype(w2_ref.dtype), w2_ref[...],
                preferred_element_type=jnp.float32)
    o_ref[...] = (y + b2_ref[...]).astype(o_ref.dtype)


def feed_forward_pallas(x, params: FFNParams, *, block_batch=None, out_dtype=None):
    """Fused Linear -> ReLU -> Linear forward pass.

    x:      (B, input_size), any float dtype
    params: FFNParams from prepare_params (padded/cast once at init)
    """
    B, in_size = x.shape
    assert in_size == params.input_size
    hid_p = params.w1.shape[1]
    out_p = params.w2.shape[1]
    out_size = params.output_size
    out_dtype = jnp.dtype(out_dtype) if out_dtype is not None else jnp.dtype(x.dtype)

    w_item = params.w1.dtype.itemsize
    x_item = jnp.dtype(x.dtype).itemsize
    o_item = out_dtype.itemsize

    # ---- tile-row choice: packed-sublane aligned, VMEM-budgeted, megacore aware ---
    sub = max(_packed_sublane(x.dtype), _packed_sublane(out_dtype))
    budget = _vmem_budget_bytes()
    # Resident weights/biases (counted 2x: the pipeline double-buffers them even
    # though their constant index_map DMAs them only once).
    resident = (2 * (params.w1.size + params.w2.size) * w_item
                + 2 * (params.b1.size + params.b2.size) * 4)
    # Per-batch-row VMEM cost: double-buffered x/out tiles + f32 intermediates.
    per_row = (2 * in_size * x_item + 2 * out_p * o_item
               + (hid_p + out_p) * 4 + hid_p * w_item)
    if budget > resident:
        row_cap = max(sub, ((budget - resident) // per_row) // sub * sub)
    else:
        row_cap = sub
    # TODO(synk): if resident weights alone exceed the VMEM budget (v7x, very wide
    # layers), switch to a second "arbitrary" grid axis over hidden with an f32
    # VMEM accumulator instead of keeping both weight matrices fully resident.
    row_cap = min(row_cap, block_batch or 1024)
    row_cap = max(sub, _round_up(row_cap, sub))

    if B <= sub:
        tb = sub
    else:
        # At least 2 batch tiles when the batch permits, so the second TensorCore
        # on v7x gets work under dimension_semantics=("parallel",).
        ntiles = max(2, _cdiv(B, row_cap))
        tb = min(row_cap, _round_up(_cdiv(B, ntiles), sub))
    b_p = _round_up(B, tb)
    nb = b_p // tb

    # Only the batch may need padding (activations only; weights prepared at init,
    # x's lane dim used at its natural size). Pure pass-through when aligned.
    x_in = x if b_p == B else jnp.pad(x, ((0, b_p - B), (0, 0)))

    grid_spec = pl.GridSpec(
        grid=(nb,),
        in_specs=[
            pl.BlockSpec((tb, in_size), lambda i: (i, 0)),      # x: tiled over batch
            pl.BlockSpec((in_size, hid_p), lambda i: (0, 0)),   # w1: VMEM-resident
            pl.BlockSpec((1, hid_p), lambda i: (0, 0)),         # b1: VMEM-resident
            pl.BlockSpec((hid_p, out_p), lambda i: (0, 0)),     # w2: VMEM-resident
            pl.BlockSpec((1, out_p), lambda i: (0, 0)),         # b2: VMEM-resident
        ],
        out_specs=pl.BlockSpec((tb, out_p), lambda i: (i, 0)),  # lane-dense output
    )
    # NOTE: on VMEM-tight v7x configs, pipeline_mode=pl.Buffered(1) on the four
    # resident operands frees one extra weight copy; left at the default here for
    # portability across jax versions (their constant index_map already DMAs once).

    flops = 2 * b_p * (in_size * hid_p + hid_p * out_p)
    bytes_accessed = (b_p * in_size * x_item
                      + (params.w1.size + params.w2.size) * w_item
                      + (params.b1.size + params.b2.size) * 4
                      + b_p * out_p * o_item)

    y = pl.pallas_call(
        _ffn_kernel,
        out_shape=jax.ShapeDtypeStruct((b_p, out_p), out_dtype),
        grid_spec=grid_spec,
        compiler_params=pltpu.CompilerParams(
            dimension_semantics=("parallel",),   # batch tiles shard across TCs (v7x)
            vmem_limit_bytes=int(budget)),
        cost_estimate=pl.CostEstimate(
            flops=flops, transcendentals=0, bytes_accessed=bytes_accessed),
    )(x_in, params.w1, params.b1, params.w2, params.b2)

    if b_p != B or out_p != out_size:
        y = y[:B, :out_size]
    return y


def init_params(key, input_size, hidden_size, output_size):
    """Deterministic init mimicking PyTorch nn.Linear (uniform +-1/sqrt(fan_in))."""
    k1, k2, k3, k4 = jax.random.split(key, 4)
    bound1 = 1.0 / jnp.sqrt(input_size)
    bound2 = 1.0 / jnp.sqrt(hidden_size)
    # Stored pre-transposed: (in, out)
    w1_t = jax.random.uniform(k1, (input_size, hidden_size), jnp.float32, -bound1, bound1)
    b1 = jax.random.uniform(k2, (1, hidden_size), jnp.float32, -bound1, bound1)
    w2_t = jax.random.uniform(k3, (hidden_size, output_size), jnp.float32, -bound2, bound2)
    b2 = jax.random.uniform(k4, (1, output_size), jnp.float32, -bound2, bound2)
    return w1_t, b1, w2_t, b2


def reference_forward(x, w1_t, b1, w2_t, b2):
    h = jnp.maximum(x @ w1_t + b1, 0.0)
    return h @ w2_t + b2


if __name__ == "__main__":
    # Small shapes consistent with the module: batch=8, input=32, hidden=64, output=16
    batch, input_size, hidden_size, output_size = 8, 32, 64, 16

    key = jax.random.PRNGKey(0)
    kx, kp = jax.random.split(key)
    x = jax.random.normal(kx, (batch, input_size), jnp.float32)
    w1_t, b1, w2_t, b2 = init_params(kp, input_size, hidden_size, output_size)
    ref = reference_forward(x, w1_t, b1, w2_t, b2)

    # Default path: bf16 weights / MXU fast path with f32 accumulation.
    params_bf16 = prepare_params(w1_t, b1, w2_t, b2)          # compute_dtype=bf16
    out = jax.block_until_ready(feed_forward_pallas(x, params_bf16))
    assert out.shape == (batch, output_size)
    assert out.dtype == x.dtype
    assert jnp.allclose(out, ref, atol=5e-2, rtol=5e-2), "bf16 path mismatch vs reference"

    # Exact f32 path for a tight numerical check.
    params_f32 = prepare_params(w1_t, b1, w2_t, b2, compute_dtype=jnp.float32)
    out_f32 = jax.block_until_ready(feed_forward_pallas(x, params_f32))
    assert out_f32.shape == (batch, output_size)
    assert jnp.allclose(out_f32, ref, atol=1e-5, rtol=1e-5), "f32 path mismatch vs reference"

    print("KERNEL_OK")
</pallas_src>

<mosaic_0001>
module attributes {stable_mosaic.version = 11 : i64} {
  func.func @_ffn_kernel(%arg0: i32, %arg1: memref<8x32xf32, #tpu.memory_space<vmem>>, %arg2: memref<32x128xbf16, #tpu.memory_space<vmem>>, %arg3: memref<1x128xf32, #tpu.memory_space<vmem>>, %arg4: memref<128x128xbf16, #tpu.memory_space<vmem>>, %arg5: memref<1x128xf32, #tpu.memory_space<vmem>>, %arg6: memref<8x128xf32, #tpu.memory_space<vmem>>) attributes {dimension_semantics = [#tpu.dimension_semantics<parallel>], iteration_bounds = array<i64: 1>, scalar_prefetch = 0 : i64, scratch_operands = 0 : i64, tpu.core_type = #tpu.core_type<tc>, window_params = [{transform_indices = @transform_0, window_bounds = array<i64: 8, 32>}, {pipeline_mode = #tpu.pipeline_mode<synchronous>, transform_indices = @transform_1, window_bounds = array<i64: 32, 128>}, {pipeline_mode = #tpu.pipeline_mode<synchronous>, transform_indices = @transform_2, window_bounds = array<i64: 1, 128>}, {pipeline_mode = #tpu.pipeline_mode<synchronous>, transform_indices = @transform_3, window_bounds = array<i64: 128, 128>}, {pipeline_mode = #tpu.pipeline_mode<synchronous>, transform_indices = @transform_4, window_bounds = array<i64: 1, 128>}, {transform_indices = @transform_5, window_bounds = array<i64: 8, 128>}]} {
    %c0 = arith.constant 0 : index
    %c0_0 = arith.constant 0 : index
    %0 = vector.load %arg1[%c0, %c0_0] : memref<8x32xf32, #tpu.memory_space<vmem>>, vector<8x32xf32>
    %1 = arith.truncf %0 : vector<8x32xf32> to vector<8x32xbf16>
    %c0_1 = arith.constant 0 : index
    %c0_2 = arith.constant 0 : index
    %2 = vector.load %arg2[%c0_1, %c0_2] : memref<32x128xbf16, #tpu.memory_space<vmem>>, vector<32x128xbf16>
    %cst = arith.constant dense<0.000000e+00> : vector<8x128xf32>
    %3 = tpu.matmul %1, %2, %cst {dimension_numbers = #tpu.dot_dimension_numbers<[1], [0], [0], [1], [0, 0, 1, 1], [], []>} : vector<8x32xbf16>, vector<32x128xbf16>, vector<8x128xf32> -> vector<8x128xf32>
    %c0_3 = arith.constant 0 : index
    %c0_4 = arith.constant 0 : index
    %4 = vector.load %arg3[%c0_3, %c0_4] : memref<1x128xf32, #tpu.memory_space<vmem>>, vector<1x128xf32>
    %5 = vector.broadcast %4 : vector<1x128xf32> to vector<8x128xf32>
    %6 = arith.addf %3, %5 : vector<8x128xf32>
    %cst_5 = arith.constant 0.000000e+00 : f32
    %7 = vector.broadcast %cst_5 : f32 to vector<8x128xf32>
    %8 = arith.maximumf %6, %7 : vector<8x128xf32>
    %9 = arith.truncf %8 : vector<8x128xf32> to vector<8x128xbf16>
    %c0_6 = arith.constant 0 : index
    %c0_7 = arith.constant 0 : index
    %10 = vector.load %arg4[%c0_6, %c0_7] : memref<128x128xbf16, #tpu.memory_space<vmem>>, vector<128x128xbf16>
    %cst_8 = arith.constant dense<0.000000e+00> : vector<8x128xf32>
    %11 = tpu.matmul %9, %10, %cst_8 {dimension_numbers = #tpu.dot_dimension_numbers<[1], [0], [0], [1], [0, 0, 1, 1], [], []>} : vector<8x128xbf16>, vector<128x128xbf16>, vector<8x128xf32> -> vector<8x128xf32>
    %c0_9 = arith.constant 0 : index
    %c0_10 = arith.constant 0 : index
    %12 = vector.load %arg5[%c0_9, %c0_10] : memref<1x128xf32, #tpu.memory_space<vmem>>, vector<1x128xf32>
    %13 = vector.broadcast %12 : vector<1x128xf32> to vector<8x128xf32>
    %14 = arith.addf %11, %13 : vector<8x128xf32>
    %c0_11 = arith.constant 0 : index
    %c0_12 = arith.constant 0 : index
    %15 = vector.load %arg6[%c0_11, %c0_12] : memref<8x128xf32, #tpu.memory_space<vmem>>, vector<8x128xf32>
    tpu.vector_store %arg6[%c0_11, %c0_12], %14 {strides = array<i32>} : memref<8x128xf32, #tpu.memory_space<vmem>>, vector<8x128xf32>,
    return
  }
  func.func @transform_0(%arg0: i32) -> (i32, i32) {
    %c0_i32 = arith.constant 0 : i32
    %c0_i32_0 = arith.constant 0 : i32
    return %arg0, %c0_i32 : i32, i32
  }
  func.func @transform_1(%arg0: i32) -> (i32, i32) {
    %c0_i32 = arith.constant 0 : i32
    %c0_i32_0 = arith.constant 0 : i32
    %c0_i32_1 = arith.constant 0 : i32
    return %c0_i32, %c0_i32_0 : i32, i32
  }
  func.func @transform_2(%arg0: i32) -> (i32, i32) {
    %c0_i32 = arith.constant 0 : i32
    %c0_i32_0 = arith.constant 0 : i32
    %c0_i32_1 = arith.constant 0 : i32
    return %c0_i32, %c0_i32_0 : i32, i32
  }
  func.func @transform_3(%arg0: i32) -> (i32, i32) {
    %c0_i32 = arith.constant 0 : i32
    %c0_i32_0 = arith.constant 0 : i32
    %c0_i32_1 = arith.constant 0 : i32
    return %c0_i32, %c0_i32_0 : i32, i32
  }
  func.func @transform_4(%arg0: i32) -> (i32, i32) {
    %c0_i32 = arith.constant 0 : i32
    %c0_i32_0 = arith.constant 0 : i32
    %c0_i32_1 = arith.constant 0 : i32
    return %c0_i32, %c0_i32_0 : i32, i32
  }
  func.func @transform_5(%arg0: i32) -> (i32, i32) {
    %c0_i32 = arith.constant 0 : i32
    %c0_i32_0 = arith.constant 0 : i32
    return %arg0, %c0_i32 : i32, i32
  }
}

</mosaic_0001>

<bundles_post_ra>
// kernel: tpu_custom_call.1
= control target key start
LH: loop header
LB: loop body
LE: loop exit
PB: predicated region body
PF: predicated region fallthrough
CT: control target
= control target key end

     0   :  { %10 = vsyncpa [#allocation3], 0  ;;  %s523_s0 = inlined_call_operand.hbm [shape: f32[8,32], index: 0, kind: input, shape index: {}]   ;;  %s524_s1 = inlined_call_operand.hbm [shape: bf16[32,128], index: 1, kind: input, shape index: {}]   ;;  %s525_s2 = inlined_call_operand.vmem [shape: f32[1,128], index: 2, kind: input, shape index: {}]   ;;  %s526_s3 = inlined_call_operand.hbm [shape: bf16[128,128], index: 3, kind: input, shape index: {}]   ;;  %s527_s4 = inlined_call_operand.vmem [shape: f32[1,128], index: 4, kind: input, shape index: {}]   ;;  %s528_s5 = inlined_call_operand.hbm [shape: f32[8,128], index: 5, kind: output, shape index: {}]  }
   0x1   :  { %11 = vsyncpa [#allocation6], 0 }
   0x2   :  { %12 = vsyncpa [#allocation4], 0  ;;  %s425_s18 = smov [#allocation5]   ;;  %s331_s22 = scalar_lea.hbm %s524_s1, 256 }
   0x3   :  { %s28_s19 = sshll.u32 %s425_s18, 4  ;;  %p332_p0 = scmp.ne.s32.totalorder %s524_s1, %s331_s22  ;;  %s29_s19 = int_to_ptr.vmem [resolvable:$true] %s28_s19 }
   0x4   :  { %p335_p1 = scmp.lt.u32.totalorder %s331_s22, %s524_s1 }
   0x6   :  { %p337_p2 = pnand %p335_p1, %p332_p0 }
   0x8   :  { %340 = shalt.err (!%p337_p2)
}
   0x9   :  { %s341_s27 = scalar_lea.vmem %s29_s19, 256  ;;  %p346_p4 = scmp.lt.s32.totalorder %s29_s19, %s29_s19 }
   0xa   :  { %p342_p3 = scmp.ne.s32.totalorder %s29_s19, %s341_s27  ;;  %p347_p5 = scmp.lt.s32.totalorder %s341_s27, %s341_s27 }
   0xc   :  { %p348_p6 = por %p347_p5, %p346_p4 }
   0xe   :  { %p349_p7 = pnand %p348_p6, %p342_p3 }
  0x10   :  { %352 = shalt.err (!%p349_p7)
}
  0x11   :  { %s426_s28 = smov 64   ;;  %s427_s29 = smov 4  }
  0x12   :  { %34 = dma.hbm_to_vmem [thread:$0]  %s524_s1, 256, %s29_s19, [#allocation6], %s426_s28, %s426_s28, %s427_s29  }
  0x13   :  { %s428_s7 = smov [#allocation2]   ;;  %s429_s9 = smov [#allocation7]  }
  0x14   :  { %s19_s8 = sshll.u32 %s428_s7, 4  ;;  %s42_s10 = sshll.u32 %s429_s9, 4  ;;  %s20_s8 = int_to_ptr.vmem [resolvable:$true] %s19_s8  ;;  %s43_s10 = int_to_ptr.vmem [resolvable:$true] %s42_s10 }
  0x15   :  { %s353_s13 = scalar_lea.hbm %s523_s0, 128 }
  0x16   :  { %p354_p8 = scmp.ne.s32.totalorder %s523_s0, %s353_s13  ;;  %p357_p9 = scmp.lt.u32.totalorder %s353_s13, %s523_s0 }
  0x18   :  { %p359_p10 = pnand %p357_p9, %p354_p8 }
  0x1a   :  { %362 = shalt.err (!%p359_p10)
}
  0x1b   :  { %s363_s1 = scalar_lea.vmem %s20_s8, 128  ;;  %p368_p12 = scmp.lt.s32.totalorder %s20_s8, %s20_s8 }
  0x1c   :  { %p364_p11 = scmp.ne.s32.totalorder %s20_s8, %s363_s1  ;;  %p369_p13 = scmp.lt.s32.totalorder %s363_s1, %s363_s1 }
  0x1e   :  { %p370_p0 = por %p369_p13, %p368_p12 }
  0x20   :  { %p371_p1 = pnand %p370_p0, %p364_p11 }
  0x22   :  { %374 = shalt.err (!%p371_p1)
}
  0x23   :  { %22 = dma.hbm_to_vmem [thread:$0]  %s523_s0, 128, %s20_s8, [#allocation3]  }
  0x24   :  { %s375_s22 = scalar_lea.hbm %s526_s3, 1024 }
  0x25   :  { %p376_p2 = scmp.ne.s32.totalorder %s526_s3, %s375_s22  ;;  %p379_p3 = scmp.lt.u32.totalorder %s375_s22, %s526_s3 }
  0x27   :  { %p381_p4 = pnand %p379_p3, %p376_p2 }
  0x29   :  { %384 = shalt.err (!%p381_p4)
}
  0x2a   :  { %s385_s27 = scalar_lea.vmem %s43_s10, 1024  ;;  %p390_p6 = scmp.lt.s32.totalorder %s43_s10, %s43_s10 }
  0x2b   :  { %p386_p5 = scmp.ne.s32.totalorder %s43_s10, %s385_s27  ;;  %p391_p7 = scmp.lt.s32.totalorder %s385_s27, %s385_s27 }
  0x2d   :  { %p392_p8 = por %p391_p7, %p390_p6 }
  0x2f   :  { %p393_p9 = pnand %p392_p8, %p386_p5 }
  0x31   :  { %396 = shalt.err (!%p393_p9)
}
  0x32   :  { %48 = dma.hbm_to_vmem [thread:$0]  %s526_s3, 1024, %s43_s10, [#allocation6], %s426_s28, %s426_s28, %s427_s29  }
  0x33   :  { %419 = dma.done.wait [#allocation3], 128  }
  0x34   :  { %420 = vsyncadd [#allocation3], 4294967168 }
  0x35   :  { %421 = dma.done.wait [#allocation6], 1280  }
  0x36   :  { %422 = vsyncadd [#allocation6], 4294966016  ;;  %v430_v0 = vmov 0.0   ;;  %vm431_vm0 = vmmov 0   ;;  %v321_v1 = vld [vmem:[#allocation5] sm:$0xff]   ;;  %v322_v2 = vld [vmem:[#allocation5 + $0x8] sm:$0xff]  }
  0x37   :  { %285 = vmatprep.subr.bf16.mxu0 %v430_v0  ;;  %289 = vmatprep.mubr.msk.bf16.mxu0 %vm431_vm0, %v430_v0  ;;  %v61_v3 = vld [vmem:[#allocation2] sm:$0xff]  ;;  %v323_v4 = vld [vmem:[#allocation7] sm:$0xff]   ;;  %vm86_vm1 = vcmask 261120   ;;  %v325_v7 = vld [vmem:[#allocation7 + $0x10] sm:$0xff]   ;;  %s432_s7 = smov [#allocation8]  }
  0x38   :  { %293 = vmatprep.subr.bf16.mxu1 %v430_v0  ;;  %309 = vmatprep.mubr.msk.bf16.mxu1 %vm431_vm0, %v430_v0  ;;  %v62_v5 = vpack.c.bf16 %v61_v3, %v61_v3  ;;  %v324_v6 = vld [vmem:[#allocation7 + $0x8] sm:$0xff]   ;;  %v326_v8 = vld [vmem:[#allocation7 + $0x18] sm:$0xff]   ;;  %v327_v9 = vld [vmem:[#allocation7 + $0x20] sm:$0xff]   ;;  %s250_s8 = sshll.u32 %s432_s7, 4  ;;  %s251_s8 = int_to_ptr.vmem [resolvable:$true] %s250_s8 }
  0x39   :  { %286 = vmatpush3.bf16.msra.mxu0 %v321_v1  ;;  %294 = vmatpush3.bf16.msra.mxu1 %v323_v4  ;;  %v328_v10 = vld [vmem:[#allocation7 + $0x28] sm:$0xff]   ;;  %v329_v11 = vld [vmem:[#allocation7 + $0x30] sm:$0xff]   ;;  %v330_v12 = vld [vmem:[#allocation7 + $0x38] sm:$0xff]   ;;  %p402_p11 = scmp.lt.s32.totalorder %s251_s8, %s251_s8 }
  0x3a   :  { %287 = vmatprep.subr.bf16.mxu0 %v430_v0  ;;  %295 = vmatprep.subr.bf16.mxu1 %v430_v0  ;;  %v260_v13 = vld [vmem:[%s525_s2] ss:$0 sm:$0xff]  ;;  %s397_s2 = scalar_lea.vmem %s251_s8, 128 }
  0x3b   :  { %v264_v21 = vld [vmem:[%s527_s4] ss:$0 sm:$0xff]  ;;  %p398_p10 = scmp.ne.s32.totalorder %s251_s8, %s397_s2  ;;  %p403_p12 = scmp.lt.s32.totalorder %s397_s2, %s397_s2 }
  0x3d   :  { %288 = vmatpush3.bf16.msra.mxu0 %v322_v2  ;;  %296 = vmatpush3.bf16.msra.mxu1 %v324_v6  ;;  %p404_p13 = por %p403_p12, %p402_p11 }
  0x3e   :  { %297 = vmatprep.subr.bf16.mxu1 %v430_v0 }
  0x3f   :  { %p405_p0 = pnand %p404_p13, %p398_p10 }
  0x40   :  { %290 = vmatmul.mubr.msk.bf16.vlgmr.msra.gmra.mrb[0].mxu0 %vm86_vm1, %v62_v5 }
  0x41   :  { %298 = vmatpush3.bf16.msra.mxu1 %v325_v7 }
  0x42   :  { %299 = vmatprep.subr.bf16.mxu1 %v430_v0 }
  0x45   :  { %300 = vmatpush3.bf16.msra.mxu1 %v326_v8 }
  0x46   :  { %301 = vmatprep.subr.bf16.mxu1 %v430_v0 }
  0x49   :  { %302 = vmatpush3.bf16.msra.mxu1 %v327_v9 }
  0x4a   :  { %303 = vmatprep.subr.bf16.mxu1 %v430_v0 }
  0x4d   :  { %304 = vmatpush3.bf16.msra.mxu1 %v328_v10 }
  0x4e   :  { %305 = vmatprep.subr.bf16.mxu1 %v430_v0 }
  0x51   :  { %306 = vmatpush3.bf16.msra.mxu1 %v329_v11 }
  0x52   :  { %307 = vmatprep.subr.bf16.mxu1 %v430_v0 }
  0x55   :  { %308 = vmatpush3.bf16.msra.mxu1 %v330_v12 }
 0x113   :  { %v124_v14 = vpop.f32.mrb[0].mxu0 }
 0x114   :  { %v125_v15 = vadd.f32 %v260_v13, %v124_v14  ;;  %v291_v16 = vpop.f32.mrb[1].mxu0 }
 0x115   :  { %v127_v17 = vpop.f32.mrb[2].mxu0 }
 0x116   :  { %v130_v18 = vmax.f32 %v125_v15, 0.0  ;;  %v292_v19 = vpop.f32.mrb[3].mxu0 }
 0x118   :  { %v131_v20 = vpack.c.bf16 %v130_v18, %v130_v18 }
 0x11a   :  { %310 = vmatmul.mubr.bf16.vlgmr.msra.gmra.mrb[0].mxu1 %v131_v20 }
 0x1ed   :  { %v237_v22 = vpop.f32.mrb[0].mxu1 }
 0x1ee   :  { %v238_v23 = vadd.f32 %v264_v21, %v237_v22  ;;  %v311_v24 = vpop.f32.mrb[1].mxu1 }
 0x1ef   :  { %v240_v25 = vpop.f32.mrb[2].mxu1 }
 0x1f0   :  { %243 = vst [vmem:[#allocation8] sm:$0xff] %v238_v23  ;;  %v312_v26 = vpop.f32.mrb[3].mxu1 }
 0x1f1   :  { %408 = shalt.err (!%p405_p0)
}
 0x1f2   :  { %s409_s4 = scalar_lea.hbm %s528_s5, 128 }
 0x1f3   :  { %p410_p1 = scmp.ne.s32.totalorder %s528_s5, %s409_s4  ;;  %p413_p2 = scmp.lt.u32.totalorder %s409_s4, %s528_s5 }
 0x1f5   :  { %p415_p3 = pnand %p413_p2, %p410_p1 }
 0x1f7   :  { %418 = shalt.err (!%p415_p3)
}
 0x1f8   :  { %253 = dma.vmem_to_hbm [thread:$0]  %s251_s8, 128, %s528_s5, [#allocation4]  }
 0x1f9   :  { %423 = dma.done.wait [#allocation4], 128  }
 0x1fa   :  { %424 = vsyncadd [#allocation4], 4294967168 }
 0x1fb   :  { %257 = vsyncpa [#allocation3], 1 }
 0x1fc   :  { %258 = vsyncpa [#allocation6], 1 }
 0x1fd   :  { %259 = vsyncpa [#allocation4], 1 }

</bundles_post_ra>
